<compile_context>
chip_gen: v5e
topology: v5e:2x2
jax: 0.10.0
libtpu: 0.0.40
codegen_flags: <defaults>
</compile_context>

<pallas_src>
import functools

import jax
import jax.numpy as jnp
from jax.experimental import pallas as pl
from jax.experimental.pallas import tpu as pltpu

TAU = 0.05


def _pick_tile(batch_num: int) -> int:
    # Largest batch tile (multiple of 8, <= 256) that divides batch_num;
    # otherwise fall back to the whole batch in one block (full-dim block is
    # always a legal BlockSpec).
    for t in (256, 128, 64, 32, 16, 8):
        if batch_num % t == 0:
            return t
    return batch_num


def _infonce_kernel(pos_ref, neg_ref, out_ref, *, inv_tau, inv_batch):
    i = pl.program_id(0)

    @pl.when(i == 0)
    def _init():
        out_ref[...] = jnp.zeros_like(out_ref)

    pos = pos_ref[...].astype(jnp.float32) * inv_tau            # (tb, 1)
    neg = neg_ref[...].astype(jnp.float32) * inv_tau            # (tb, S)

    pos_e = jnp.exp(pos)                                        # EUP
    neg_sum = jnp.sum(jnp.exp(neg), axis=1, keepdims=True)      # EUP + XLU reduce
    denom = neg_sum + pos_e
    row_loss = -jnp.log(pos_e / denom)                          # (tb, 1)

    # Accumulate the per-tile loss sum into the resident (1,1) output block.
    out_ref[...] += jnp.sum(row_loss, keepdims=True)

    @pl.when(i == pl.num_programs(0) - 1)
    def _finalize():
        out_ref[...] = out_ref[...] * inv_batch                 # mean over batch


def infonce_loss(pos_score, neg_score, batch_num, neg_sample, *, tau=TAU):
    """pos_score: (B,) or (B,1); neg_score: anything reshapeable to (B, S)."""
    pos = jnp.asarray(pos_score, jnp.float32).reshape(batch_num, 1)
    neg = jnp.asarray(neg_score, jnp.float32).reshape(batch_num, neg_sample)

    tile_b = _pick_tile(batch_num)
    grid = (batch_num // tile_b,)

    kernel = functools.partial(
        _infonce_kernel, inv_tau=1.0 / tau, inv_batch=1.0 / batch_num
    )

    cost = pl.CostEstimate(
        flops=2 * batch_num * neg_sample + 6 * batch_num,
        transcendentals=batch_num * (neg_sample + 2),
        bytes_accessed=4 * (batch_num * neg_sample + batch_num + 1),
    )

    out = pl.pallas_call(
        kernel,
        out_shape=jax.ShapeDtypeStruct((1, 1), jnp.float32),
        grid_spec=pltpu.PrefetchScalarGridSpec(
            num_scalar_prefetch=0,
            grid=grid,
            in_specs=[
                pl.BlockSpec((tile_b, 1), lambda i: (i, 0)),           # pos tile
                pl.BlockSpec((tile_b, neg_sample), lambda i: (i, 0)),  # neg tile
            ],
            out_specs=pl.BlockSpec((1, 1), lambda i: (0, 0)),          # resident acc
        ),
        compiler_params=pltpu.CompilerParams(
            dimension_semantics=("arbitrary",),  # reduction axis (accumulates output)
        ),
        cost_estimate=cost,
    )(pos, neg)
    return out[0, 0]


def _reference(pos_score, neg_score, batch_num, neg_sample, tau=TAU):
    inv_tau = 1.0 / tau
    neg = jnp.asarray(neg_score, jnp.float32).reshape(batch_num, neg_sample)
    pos = jnp.exp(jnp.asarray(pos_score, jnp.float32).reshape(batch_num, 1) * inv_tau)
    neg = jnp.sum(jnp.exp(neg * inv_tau), axis=1, keepdims=True)
    denom = neg + pos
    return jnp.mean(-jnp.log(pos / denom))


if __name__ == "__main__":
    batch_num, neg_sample = 16, 128  # small, lane-aligned demo shapes

    key = jax.random.PRNGKey(0)
    k1, k2 = jax.random.split(key)
    pos_score = jax.random.normal(k1, (batch_num, 1), dtype=jnp.float32)
    neg_score = jax.random.normal(k2, (batch_num * neg_sample,), dtype=jnp.float32)

    out = infonce_loss(pos_score, neg_score, batch_num, neg_sample)
    out = jax.block_until_ready(out)

    ref = _reference(pos_score, neg_score, batch_num, neg_sample)
    assert out.shape == (), out.shape
    assert jnp.allclose(out, ref, atol=1e-4, rtol=1e-4), (out, ref)

    print("KERNEL_OK")
</pallas_src>

<mosaic_0001>
module attributes {stable_mosaic.version = 11 : i64} {
  func.func @_infonce_kernel(%arg0: i32, %arg1: memref<16x1xf32, #tpu.memory_space<vmem>>, %arg2: memref<16x128xf32, #tpu.memory_space<vmem>>, %arg3: memref<1x1xf32, #tpu.memory_space<vmem>>) attributes {dimension_semantics = [#tpu.dimension_semantics<arbitrary>], iteration_bounds = array<i64: 1>, scalar_prefetch = 0 : i64, scratch_operands = 0 : i64, tpu.core_type = #tpu.core_type<tc>, window_params = [{transform_indices = @transform_0, window_bounds = array<i64: 16, 1>}, {transform_indices = @transform_1, window_bounds = array<i64: 16, 128>}, {pipeline_mode = #tpu.pipeline_mode<synchronous>, transform_indices = @transform_2, window_bounds = array<i64: 1, 1>}]} {
    %c0_i32 = arith.constant 0 : i32
    %0 = arith.cmpi eq, %arg0, %c0_i32 : i32
    %1 = arith.extui %0 : i1 to i32
    %c0_i32_0 = arith.constant 0 : i32
    %2 = arith.cmpi ne, %1, %c0_i32_0 : i32
    scf.if %2 {
      %cst_14 = arith.constant 0.000000e+00 : f32
      %29 = vector.broadcast %cst_14 : f32 to vector<1x1xf32>
      %c0_15 = arith.constant 0 : index
      %c0_16 = arith.constant 0 : index
      %30 = vector.load %arg3[%c0_15, %c0_16] : memref<1x1xf32, #tpu.memory_space<vmem>>, vector<1x1xf32>
      tpu.vector_store %arg3[%c0_15, %c0_16], %29 {strides = array<i32>} : memref<1x1xf32, #tpu.memory_space<vmem>>, vector<1x1xf32>,
    } else {
    }
    %c0 = arith.constant 0 : index
    %c0_1 = arith.constant 0 : index
    %3 = vector.load %arg1[%c0, %c0_1] : memref<16x1xf32, #tpu.memory_space<vmem>>, vector<16x1xf32>
    %cst = arith.constant 2.000000e+01 : f32
    %4 = vector.broadcast %cst : f32 to vector<16x1xf32>
    %5 = arith.mulf %3, %4 : vector<16x1xf32>
    %c0_2 = arith.constant 0 : index
    %c0_3 = arith.constant 0 : index
    %6 = vector.load %arg2[%c0_2, %c0_3] : memref<16x128xf32, #tpu.memory_space<vmem>>, vector<16x128xf32>
    %cst_4 = arith.constant 2.000000e+01 : f32
    %7 = vector.broadcast %cst_4 : f32 to vector<16x128xf32>
    %8 = arith.mulf %6, %7 : vector<16x128xf32>
    %9 = math.exp %5 : vector<16x1xf32>
    %10 = math.exp %8 : vector<16x128xf32>
    %cst_5 = arith.constant dense<0.000000e+00> : vector<16xf32>
    %11 = vector.multi_reduction <add>, %10, %cst_5 [1] : vector<16x128xf32> to vector<16xf32>
    %12 = vector.shape_cast %11 : vector<16xf32> to vector<16x1xf32>
    %13 = arith.addf %12, %9 : vector<16x1xf32>
    %14 = arith.divf %9, %13 : vector<16x1xf32>
    %15 = math.log %14 : vector<16x1xf32>
    %cst_6 = arith.constant 0.000000e+00 : f32
    %16 = vector.broadcast %cst_6 : f32 to vector<16x1xf32>
    %17 = arith.subf %16, %15 : vector<16x1xf32>
    %c0_7 = arith.constant 0 : index
    %c0_8 = arith.constant 0 : index
    %18 = vector.load %arg3[%c0_7, %c0_8] : memref<1x1xf32, #tpu.memory_space<vmem>>, vector<1x1xf32>
    %19 = vector.shape_cast %17 : vector<16x1xf32> to vector<1x16x1xf32>
    %cst_9 = arith.constant dense<0.000000e+00> : vector<1xf32>
    %20 = vector.multi_reduction <add>, %19, %cst_9 [1, 2] : vector<1x16x1xf32> to vector<1xf32>
    %21 = vector.shape_cast %20 : vector<1xf32> to vector<1x1x1xf32>
    %22 = vector.extract %21[0, 0, 0] : f32 from vector<1x1x1xf32>
    %23 = vector.broadcast %22 : f32 to vector<1x1xf32>
    %24 = arith.addf %18, %23 : vector<1x1xf32>
    %c0_10 = arith.constant 0 : index
    %c0_11 = arith.constant 0 : index
    %25 = vector.load %arg3[%c0_10, %c0_11] : memref<1x1xf32, #tpu.memory_space<vmem>>, vector<1x1xf32>
    tpu.vector_store %arg3[%c0_10, %c0_11], %24 {strides = array<i32>} : memref<1x1xf32, #tpu.memory_space<vmem>>, vector<1x1xf32>,
    %c0_i32_12 = arith.constant 0 : i32
    %26 = arith.cmpi eq, %arg0, %c0_i32_12 : i32
    %27 = arith.extui %26 : i1 to i32
    %c0_i32_13 = arith.constant 0 : i32
    %28 = arith.cmpi ne, %27, %c0_i32_13 : i32
    scf.if %28 {
      %c0_14 = arith.constant 0 : index
      %c0_15 = arith.constant 0 : index
      %29 = vector.load %arg3[%c0_14, %c0_15] : memref<1x1xf32, #tpu.memory_space<vmem>>, vector<1x1xf32>
      %cst_16 = arith.constant 6.250000e-02 : f32
      %30 = vector.broadcast %cst_16 : f32 to vector<1x1xf32>
      %31 = arith.mulf %29, %30 : vector<1x1xf32>
      %c0_17 = arith.constant 0 : index
      %c0_18 = arith.constant 0 : index
      %32 = vector.load %arg3[%c0_17, %c0_18] : memref<1x1xf32, #tpu.memory_space<vmem>>, vector<1x1xf32>
      tpu.vector_store %arg3[%c0_17, %c0_18], %31 {strides = array<i32>} : memref<1x1xf32, #tpu.memory_space<vmem>>, vector<1x1xf32>,
    } else {
    }
    return
  }
  func.func @transform_0(%arg0: i32) -> (i32, i32) {
    %c0_i32 = arith.constant 0 : i32
    %c0_i32_0 = arith.constant 0 : i32
    return %arg0, %c0_i32 : i32, i32
  }
  func.func @transform_1(%arg0: i32) -> (i32, i32) {
    %c0_i32 = arith.constant 0 : i32
    %c0_i32_0 = arith.constant 0 : i32
    return %arg0, %c0_i32 : i32, i32
  }
  func.func @transform_2(%arg0: i32) -> (i32, i32) {
    %c0_i32 = arith.constant 0 : i32
    %c0_i32_0 = arith.constant 0 : i32
    %c0_i32_1 = arith.constant 0 : i32
    return %c0_i32, %c0_i32_0 : i32, i32
  }
}

</mosaic_0001>

<bundles_post_ra>
// kernel: tpu_custom_call.1
= control target key start
LH: loop header
LB: loop body
LE: loop exit
PB: predicated region body
PF: predicated region fallthrough
CT: control target
= control target key end

     0   :  { %s197_s0 = inlined_call_operand.vmem [shape: f32[16,1], index: 0, kind: input, shape index: {}]   ;;  %s198_s1 = inlined_call_operand.vmem [shape: f32[16,128], index: 1, kind: input, shape index: {}]   ;;  %s199_s2 = inlined_call_operand.hbm [shape: f32[1,1], index: 2, kind: output, shape index: {}]  }
   0x1   :  { %v22_v0 = vld [vmem:[%s198_s1] sm:$0xff]  ;;  %v23_v1 = vld [vmem:[%s198_s1 + $0x8] sm:$0xff] }
   0x2   :  { %7 = vsyncpa [#allocation3], 0  ;;  %v24_v2 = vmul.f32 20.0, %v22_v0  ;;  %v25_v4 = vmul.f32 20.0, %v23_v1  ;;  %v18_v8 = vld [vmem:[%s197_s0] sm:$0xff]  ;;  %v19_v11 = vld [vmem:[%s197_s0 + $0x8] sm:$0xff] }
   0x3   :  { %v20_v9 = vmul.f32 20.0, %v18_v8  ;;  %v21_v12 = vmul.f32 20.0, %v19_v11  ;;  %vm77_vm8 = vcmask 7168   ;;  %vm16_vm9 = vcmask 0   ;;  %s163_s1 = smov [#allocation2]   ;;  %s107_s20 = sshll.u32 %s199_s2, 4  ;;  %s108_s20 = int_to_ptr.hbm [resolvable:$true] %s107_s20 }
   0x4   :  { %v30_v3 = vmul.f32 1.442695, %v24_v2  ;;  %v32_v5 = vmul.f32 1.442695, %v25_v4  ;;  %v162_v51 = vmov 0.0   ;;  %s105_s17 = sshll.u32 %s163_s1, 4  ;;  %s106_s17 = int_to_ptr.vmem [resolvable:$true] %s105_s17 }
   0x5   :  { %v26_v10 = vmul.f32 1.442695, %v20_v9  ;;  %v28_v13 = vmul.f32 1.442695, %v21_v12  ;;  %17 = vst.msk [vmem:[#allocation2] sm:$0x1] %vm16_vm9, %v162_v51 }
   0x6   :  { %120 = vpow2.f32 %v30_v3 }
   0x7   :  { %122 = vpow2.f32 %v32_v5 }
   0x8   :  { %124 = vpow2.f32 %v26_v10 }
   0x9   :  { %126 = vpow2.f32 %v28_v13 }
   0xc   :  { %v121_v6 = vpop.eup %120  ;;  %v76_v59 = vld [vmem:[#allocation2] sm:$0x1] }
   0xd   :  { %34 = vadd.xlane.f32.xlu0 %v121_v6  ;;  %v123_v7 = vpop.eup %122 }
   0xe   :  { %v125_v14 = vpop.eup %124 }
   0xf   :  { %v127_v17 = vpop.eup %126 }
  0x15   :  { %36 = vadd.xlane.f32.xlu0 %v123_v7 }
  0x80   :  { %v35_v15 = vpop.xlane.xlu0 %34 }
  0x81   :  { %v38_v16 = vadd.f32 %v125_v14, %v35_v15 }
  0x83   :  { %128 = vrcp.f32 %v38_v16  ;;  %v51_v23 = vand.u32 2147483648, %v38_v16  ;;  %v49_v25 = vand.u32 2147483647, %v38_v16  ;;  %vm45_vm1 = vweird.f32 %v38_v16 }
  0x85   :  { %v52_v28 = vor.u32 1.1754944e-38, %v51_v23  ;;  %vm50_vm3 = vcmp.eq.f32.partialorder %v49_v25, 8.507059e+37 }
  0x88   :  { %v37_v18 = vpop.xlane.xlu0 %36 }
  0x89   :  { %v129_v19 = vpop.eup %128  ;;  %v39_v20 = vadd.f32 %v127_v17, %v37_v18 }
  0x8a   :  { %v41_v21 = vmul.f32 %v129_v19, %v38_v16  ;;  %vm46_vm0 = vweird.f32 %v129_v19 }
  0x8b   :  { %130 = vrcp.f32 %v39_v20  ;;  %vm47_vm2 = vmor %vm45_vm1, %vm46_vm0  ;;  %v66_v34 = vand.u32 2147483648, %v39_v20  ;;  %v64_v36 = vand.u32 2147483647, %v39_v20  ;;  %vm60_vm5 = vweird.f32 %v39_v20 }
  0x8c   :  { %v42_v22 = vsub.f32 1.0, %v41_v21 }
  0x8d   :  { %v67_v38 = vor.u32 1.1754944e-38, %v66_v34  ;;  %vm65_vm7 = vcmp.eq.f32.partialorder %v64_v36, 8.507059e+37 }
  0x8e   :  { %v43_v24 = vmul.f32 %v129_v19, %v42_v22 }
  0x90   :  { %v44_v26 = vadd.f32 %v129_v19, %v43_v24 }
  0x91   :  { %v131_v27 = vpop.eup %130 }
  0x92   :  { %v56_v29 = vmul.f32 %v131_v27, %v39_v20  ;;  %v48_v30 = vsel %vm47_vm2, %v129_v19, %v44_v26  ;;  %vm61_vm4 = vweird.f32 %v131_v27 }
  0x93   :  { %v53_v31 = vsel %vm50_vm3, %v52_v28, %v48_v30  ;;  %vm62_vm6 = vmor %vm60_vm5, %vm61_vm4 }
  0x94   :  { %v57_v32 = vsub.f32 1.0, %v56_v29  ;;  %v54_v33 = vmul.f32 %v125_v14, %v53_v31 }
  0x96   :  { %v58_v35 = vmul.f32 %v131_v27, %v57_v32  ;;  %132 = vlog2.f32 %v54_v33 }
  0x98   :  { %v59_v37 = vadd.f32 %v131_v27, %v58_v35 }
  0x9a   :  { %v63_v39 = vsel %vm62_vm6, %v131_v27, %v59_v37 }
  0x9b   :  { %v68_v40 = vsel %vm65_vm7, %v67_v38, %v63_v39 }
  0x9c   :  { %v69_v41 = vmul.f32 %v127_v17, %v68_v40  ;;  %v133_v42 = vpop.eup %132 }
  0x9d   :  { %v71_v43 = vmul.f32 0.6931472, %v133_v42 }
  0x9e   :  { %134 = vlog2.f32 %v69_v41 }
  0x9f   :  { %v74_v46 = vsub.f32 0.0, %v71_v43 }
  0xa1   :  { %v78_v48 = vsel %vm77_vm8, %v74_v46, 0.0 }
  0xa4   :  { %v135_v44 = vpop.eup %134 }
  0xa5   :  { %v73_v45 = vmul.f32 0.6931472, %v135_v44 }
  0xa7   :  { %v75_v47 = vsub.f32 0.0, %v73_v45 }
  0xa9   :  { %v79_v49 = vsel %vm77_vm8, %v75_v47, 0.0 }
  0xaa   :  { %v80_v50 = vadd.f32 %v79_v49, %v78_v48 }
  0xac   :  { %81 = vadd.xlane.f32.xlu1 %v80_v50 }
 0x11f   :  { %v82_v52 = vpop.xlane.xlu1 %81 }
 0x120   :  { %v83_v53 = vrot.slane %v82_v52, 4 }
 0x122   :  { %v84_v54 = vadd.f32 %v83_v53, %v82_v52 }
 0x124   :  { %v85_v55 = vrot.slane %v84_v54, 2 }
 0x126   :  { %v86_v56 = vadd.f32 %v85_v55, %v84_v54 }
 0x128   :  { %v87_v57 = vrot.slane %v86_v56, 1 }
 0x12a   :  { %v88_v58 = vadd.f32 %v87_v57, %v86_v56 }
 0x12c   :  { %116 = vpush %v88_v58 }
 0x15d   :  { %s117_s0 = spop %116 }
 0x15e   :  { %v90_v60 = vstv %s117_s0 }
 0x15f   :  { %v91_v61 = vadd.f32 %v90_v60, %v76_v59 }
 0x161   :  { %93 = vst.msk [vmem:[#allocation2] sm:$0x1] %vm16_vm9, %v91_v61 }
 0x168   :  { %v97_v62 = vld [vmem:[#allocation2] sm:$0x1] }
 0x169   :  { %v98_v63 = vmul.f32 0.0625, %v97_v62 }
 0x16b   :  { %99 = vst.msk [vmem:[#allocation2] sm:$0x1] %vm16_vm9, %v98_v63 }
 0x16c   :  { %110 = dma.vmem_to_hbm [thread:$0]  %s106_s17, 16, %s108_s20, [#allocation3]  }
 0x16d   :  { %160 = dma.done.wait [#allocation3], 16  }
 0x16e   :  { %161 = vsyncadd [#allocation3], 4294967280 }
 0x16f   :  { %115 = vsyncpa [#allocation3], 1 }

</bundles_post_ra>
